<compile_context>
chip_gen: v7x
topology: tpu7x:2x2x1
jax: 0.10.0
libtpu: 0.0.40
codegen_flags: <defaults>
</compile_context>

<pallas_src>
import jax
import jax.numpy as jnp
from jax.experimental import pallas as pl
from jax.experimental.pallas import tpu as pltpu

LN_EPS = 1e-5  # nn.LayerNorm default


def _round_up(x, m):
    return (x + m - 1) // m * m


def _cdiv(a, b):
    return -(-a // b)


def track_embedding_kernel(x_ref, w1_ref, b1_ref, w2_ref, vec_ref, o_ref):
    """One (tile_m, dim) row tile: linear1+ReLU, linear2, residual, LayerNorm."""
    x = x_ref[...]
    x32 = x.astype(jnp.float32)          # residual path stays f32

    # linear1 + bias + ReLU + bf16 cast fused into one expression
    # (dropout1 = identity at inference). bf16 MXU operands, f32 accumulation.
    h = jnp.maximum(
        jnp.dot(x.astype(jnp.bfloat16), w1_ref[...],
                preferred_element_type=jnp.float32) + b1_ref[...],
        0.0,
    ).astype(jnp.bfloat16)

    # linear2 (dropout2 = identity at inference).
    y = jnp.dot(h, w2_ref[...], preferred_element_type=jnp.float32)

    vec = vec_ref[...]                   # rows: [b2, gamma, beta]
    r = x32 + y + vec[0:1, :]

    # LayerNorm over the real feature width; two-pass (mean, then centered
    # variance) for numerical stability, matching PyTorch's biased variance.
    mean = jnp.mean(r, axis=-1, keepdims=True)
    c = r - mean
    var = jnp.mean(c * c, axis=-1, keepdims=True)
    rhat = c * jax.lax.rsqrt(var + LN_EPS)
    o_ref[...] = (rhat * vec[1:2, :] + vec[2:3, :]).astype(o_ref.dtype)


def prepare_track_embedding_params(w1, b1, w2, b2, gamma, beta):
    """One-time weight preprocessing, hoisted out of the per-call hot path.

    Weights are stored transposed vs. PyTorch nn.Linear:
      w1: (dim_in, hidden), w2: (hidden, dim_out).
    The hidden dim is zero-padded to a multiple of 128 (lane-dense
    intermediate); padded W2 rows are zero so the result is unchanged.
    """
    dim_in, hidden = w1.shape
    dim_out = w2.shape[1]
    h_pad = _round_up(hidden, 128)
    f32 = jnp.float32
    w1_p = jnp.pad(w1.astype(f32),
                   ((0, 0), (0, h_pad - hidden))).astype(jnp.bfloat16)
    b1_p = jnp.pad(b1.astype(f32), (0, h_pad - hidden)).reshape(1, h_pad)
    w2_p = jnp.pad(w2.astype(f32),
                   ((0, h_pad - hidden), (0, 0))).astype(jnp.bfloat16)
    vec = jnp.stack([b2.astype(f32), gamma.astype(f32), beta.astype(f32)],
                    axis=0)              # (3, dim_out): b2, gamma, beta
    return {"w1": w1_p, "b1": b1_p, "w2": w2_p, "vec": vec,
            "dim_in": dim_in, "dim_out": dim_out, "h_pad": h_pad}


def _forward(x, params, tile_m_eff, grid, out_dtype, single_buffer_weights):
    n, dim_in = x.shape
    w1_p, b1_p, w2_p, vec = params["w1"], params["b1"], params["w2"], params["vec"]
    h_pad = params["h_pad"]
    dim_out = params["dim_out"]

    if single_buffer_weights:
        def w_spec(shape):
            # Grid-invariant blocks: one VMEM copy is enough.
            return pl.BlockSpec(shape, lambda i: (0, 0),
                                pipeline_mode=pl.Buffered(1))
    else:
        def w_spec(shape):
            return pl.BlockSpec(shape, lambda i: (0, 0))

    weight_bytes = (w1_p.size * w1_p.dtype.itemsize
                    + w2_p.size * w2_p.dtype.itemsize
                    + b1_p.size * b1_p.dtype.itemsize
                    + vec.size * vec.dtype.itemsize)
    out_itemsize = jnp.dtype(out_dtype).itemsize

    # Advisory cost estimate (kernel is HBM-bound).
    cost = pl.CostEstimate(
        flops=2 * n * h_pad * (dim_in + dim_out),
        transcendentals=n,
        bytes_accessed=(x.size * x.dtype.itemsize
                        + n * dim_out * out_itemsize
                        + weight_bytes))

    # Raise the scoped-VMEM limit only when the working set needs it.
    wbuf = 1 if single_buffer_weights else 2
    vmem_est = (2 * tile_m_eff * (dim_in * x.dtype.itemsize
                                  + dim_out * out_itemsize)
                + wbuf * weight_bytes
                + tile_m_eff * h_pad * 6)        # f32 h + its bf16 copy
    vmem_limit = None
    if vmem_est > 12 * 2**20:
        vmem_limit = int(min(_round_up(vmem_est * 3 // 2, 2**20), 64 * 2**20))

    return pl.pallas_call(
        track_embedding_kernel,
        out_shape=jax.ShapeDtypeStruct((n, dim_out), out_dtype),
        grid_spec=pltpu.PrefetchScalarGridSpec(
            num_scalar_prefetch=0,
            grid=grid,
            in_specs=[
                pl.BlockSpec((tile_m_eff, dim_in), lambda i: (i, 0)),  # x rows
                w_spec((dim_in, h_pad)),     # W1 (bf16), grid-invariant
                w_spec((1, h_pad)),          # b1
                w_spec((h_pad, dim_out)),    # W2 (bf16)
                w_spec((3, dim_out)),        # fused [b2; gamma; beta]
            ],
            out_specs=pl.BlockSpec((tile_m_eff, dim_out), lambda i: (i, 0)),
        ),
        compiler_params=pltpu.CompilerParams(
            dimension_semantics=("parallel",),
            vmem_limit_bytes=vmem_limit),
        cost_estimate=cost,
    )(x, w1_p, b1_p, w2_p, vec)


def track_embedding(x, params, *, tile_m=256, out_dtype=None):
    """x: (N, dim_in). Returns (N, dim_out) with dim_out == dim_in."""
    n, dim_in = x.shape
    assert dim_in == params["dim_in"]
    assert params["dim_out"] == dim_in, "residual requires dim_out == dim_in"
    assert tile_m % 8 == 0
    out_dtype = x.dtype if out_dtype is None else jnp.dtype(out_dtype)

    # Row tiling with NO N padding: the (possibly ragged) last tile relies on
    # Pallas' clipped boundary-block DMAs; all in-kernel math is row-local.
    if n <= tile_m:
        if n > 128:
            # Split into >=2 steps so the "parallel" axis can shard across
            # both v7x TensorCores instead of leaving one idle.
            tile_m_eff = max(128, _round_up(_cdiv(n, 2), 8))
        else:
            tile_m_eff = n               # single block == full array extent
    else:
        tile_m_eff = tile_m
    grid = (_cdiv(n, tile_m_eff),)

    # Only bother with single-buffered weights when double-buffering them
    # would cost real VMEM; keep a fallback for JAX versions without
    # BlockSpec(pipeline_mode=pl.Buffered(1)).
    weight_bytes = (params["w1"].size * 2 + params["w2"].size * 2
                    + params["b1"].size * 4 + params["vec"].size * 4)
    if weight_bytes > 512 * 1024:
        try:
            return _forward(x, params, tile_m_eff, grid, out_dtype,
                            single_buffer_weights=True)
        except Exception:
            pass
    return _forward(x, params, tile_m_eff, grid, out_dtype,
                    single_buffer_weights=False)


def reference(x, w1, b1, w2, b2, gamma, beta):
    h = jnp.maximum(x @ w1 + b1, 0.0)
    y = h @ w2 + b2
    r = x + y
    mean = jnp.mean(r, axis=-1, keepdims=True)
    var = jnp.var(r, axis=-1, keepdims=True)
    return (r - mean) / jnp.sqrt(var + LN_EPS) * gamma + beta


if __name__ == "__main__":
    # Small shapes implied by the module: tokens with dim_in == dim_out.
    batch, seq = 2, 8
    dim_in = dim_out = 32
    hidden = 64

    key = jax.random.PRNGKey(0)
    k_x, k_w1, k_b1, k_w2, k_b2, k_g, k_be = jax.random.split(key, 7)

    x = jax.random.normal(k_x, (batch, seq, dim_in), dtype=jnp.float32)

    # Deterministic synthetic parameters (shapes per nn.Linear / nn.LayerNorm).
    w1 = jax.random.normal(k_w1, (dim_in, hidden), dtype=jnp.float32) * 0.05
    b1 = jax.random.normal(k_b1, (hidden,), dtype=jnp.float32) * 0.05
    w2 = jax.random.normal(k_w2, (hidden, dim_out), dtype=jnp.float32) * 0.05
    b2 = jax.random.normal(k_b2, (dim_out,), dtype=jnp.float32) * 0.05
    gamma = 1.0 + 0.1 * jax.random.normal(k_g, (dim_out,), dtype=jnp.float32)
    beta = 0.1 * jax.random.normal(k_be, (dim_out,), dtype=jnp.float32)

    # One-time parameter preprocessing (model init) -- NOT in the per-call path.
    params = prepare_track_embedding_params(w1, b1, w2, b2, gamma, beta)

    x2d = x.reshape(batch * seq, dim_in)

    out = jax.block_until_ready(track_embedding(x2d, params))
    ref = reference(x2d, w1, b1, w2, b2, gamma, beta)
    assert out.shape == (batch * seq, dim_out)
    # bf16 MXU operands -> tolerance a bit looser than pure f32.
    assert jnp.allclose(out, ref, atol=2e-2, rtol=2e-2), "mismatch vs reference"

    # Also exercise the ragged last-tile path (N not a multiple of the tile;
    # no wrapper-side padding/cropping).
    x_ragged = x2d[:13]
    out_r = jax.block_until_ready(track_embedding(x_ragged, params, tile_m=8))
    ref_r = reference(x_ragged, w1, b1, w2, b2, gamma, beta)
    assert out_r.shape == (13, dim_out)
    assert jnp.allclose(out_r, ref_r, atol=2e-2, rtol=2e-2), "ragged mismatch"

    _ = out.reshape(batch, seq, dim_out)  # restore original (B, S, D) layout
    print("KERNEL_OK")
</pallas_src>

<mosaic_0001>
module attributes {stable_mosaic.version = 11 : i64} {
  func.func @track_embedding_kernel(%arg0: i32, %arg1: memref<16x32xf32, #tpu.memory_space<vmem>>, %arg2: memref<32x128xbf16, #tpu.memory_space<vmem>>, %arg3: memref<1x128xf32, #tpu.memory_space<vmem>>, %arg4: memref<128x32xbf16, #tpu.memory_space<vmem>>, %arg5: memref<3x32xf32, #tpu.memory_space<vmem>>, %arg6: memref<16x32xf32, #tpu.memory_space<vmem>>) attributes {dimension_semantics = [#tpu.dimension_semantics<parallel>], iteration_bounds = array<i64: 1>, scalar_prefetch = 0 : i64, scratch_operands = 0 : i64, tpu.core_type = #tpu.core_type<tc>, window_params = [{transform_indices = @transform_0, window_bounds = array<i64: 16, 32>}, {pipeline_mode = #tpu.pipeline_mode<synchronous>, transform_indices = @transform_1, window_bounds = array<i64: 32, 128>}, {pipeline_mode = #tpu.pipeline_mode<synchronous>, transform_indices = @transform_2, window_bounds = array<i64: 1, 128>}, {pipeline_mode = #tpu.pipeline_mode<synchronous>, transform_indices = @transform_3, window_bounds = array<i64: 128, 32>}, {pipeline_mode = #tpu.pipeline_mode<synchronous>, transform_indices = @transform_4, window_bounds = array<i64: 3, 32>}, {transform_indices = @transform_5, window_bounds = array<i64: 16, 32>}]} {
    %c0 = arith.constant 0 : index
    %c0_0 = arith.constant 0 : index
    %0 = vector.load %arg1[%c0, %c0_0] : memref<16x32xf32, #tpu.memory_space<vmem>>, vector<16x32xf32>
    %1 = arith.truncf %0 : vector<16x32xf32> to vector<16x32xbf16>
    %c0_1 = arith.constant 0 : index
    %c0_2 = arith.constant 0 : index
    %2 = vector.load %arg2[%c0_1, %c0_2] : memref<32x128xbf16, #tpu.memory_space<vmem>>, vector<32x128xbf16>
    %cst = arith.constant dense<0.000000e+00> : vector<16x128xf32>
    %3 = tpu.matmul %1, %2, %cst {dimension_numbers = #tpu.dot_dimension_numbers<[1], [0], [0], [1], [0, 0, 1, 1], [], []>} : vector<16x32xbf16>, vector<32x128xbf16>, vector<16x128xf32> -> vector<16x128xf32>
    %c0_3 = arith.constant 0 : index
    %c0_4 = arith.constant 0 : index
    %4 = vector.load %arg3[%c0_3, %c0_4] : memref<1x128xf32, #tpu.memory_space<vmem>>, vector<1x128xf32>
    %5 = vector.broadcast %4 : vector<1x128xf32> to vector<16x128xf32>
    %6 = arith.addf %3, %5 : vector<16x128xf32>
    %cst_5 = arith.constant 0.000000e+00 : f32
    %7 = vector.broadcast %cst_5 : f32 to vector<16x128xf32>
    %8 = arith.maximumf %6, %7 : vector<16x128xf32>
    %9 = arith.truncf %8 : vector<16x128xf32> to vector<16x128xbf16>
    %c0_6 = arith.constant 0 : index
    %c0_7 = arith.constant 0 : index
    %10 = vector.load %arg4[%c0_6, %c0_7] : memref<128x32xbf16, #tpu.memory_space<vmem>>, vector<128x32xbf16>
    %cst_8 = arith.constant dense<0.000000e+00> : vector<16x32xf32>
    %11 = tpu.matmul %9, %10, %cst_8 {dimension_numbers = #tpu.dot_dimension_numbers<[1], [0], [0], [1], [0, 0, 1, 1], [], []>} : vector<16x128xbf16>, vector<128x32xbf16>, vector<16x32xf32> -> vector<16x32xf32>
    %c0_9 = arith.constant 0 : index
    %c0_10 = arith.constant 0 : index
    %12 = vector.load %arg5[%c0_9, %c0_10] : memref<3x32xf32, #tpu.memory_space<vmem>>, vector<3x32xf32>
    %13 = arith.addf %0, %11 : vector<16x32xf32>
    %14 = vector.extract_strided_slice %12 {offsets = [0, 0], sizes = [1, 32], strides = [1, 1]} : vector<3x32xf32> to vector<1x32xf32>
    %15 = vector.broadcast %14 : vector<1x32xf32> to vector<16x32xf32>
    %16 = arith.addf %13, %15 : vector<16x32xf32>
    %cst_11 = arith.constant dense<0.000000e+00> : vector<16xf32>
    %17 = vector.multi_reduction <add>, %16, %cst_11 [1] : vector<16x32xf32> to vector<16xf32>
    %18 = vector.shape_cast %17 : vector<16xf32> to vector<16x1xf32>
    %cst_12 = arith.constant 3.200000e+01 : f32
    %19 = vector.broadcast %cst_12 : f32 to vector<16x1xf32>
    %20 = arith.divf %18, %19 : vector<16x1xf32>
    %21 = vector.broadcast %20 : vector<16x1xf32> to vector<16x32xf32>
    %22 = arith.subf %16, %21 : vector<16x32xf32>
    %23 = arith.mulf %22, %22 : vector<16x32xf32>
    %cst_13 = arith.constant dense<0.000000e+00> : vector<16xf32>
    %24 = vector.multi_reduction <add>, %23, %cst_13 [1] : vector<16x32xf32> to vector<16xf32>
    %25 = vector.shape_cast %24 : vector<16xf32> to vector<16x1xf32>
    %cst_14 = arith.constant 3.200000e+01 : f32
    %26 = vector.broadcast %cst_14 : f32 to vector<16x1xf32>
    %27 = arith.divf %25, %26 : vector<16x1xf32>
    %cst_15 = arith.constant 9.99999974E-6 : f32
    %28 = vector.broadcast %cst_15 : f32 to vector<16x1xf32>
    %29 = arith.addf %27, %28 : vector<16x1xf32>
    %30 = math.rsqrt %29 : vector<16x1xf32>
    %31 = vector.broadcast %30 : vector<16x1xf32> to vector<16x32xf32>
    %32 = arith.mulf %22, %31 : vector<16x32xf32>
    %33 = vector.extract_strided_slice %12 {offsets = [1, 0], sizes = [1, 32], strides = [1, 1]} : vector<3x32xf32> to vector<1x32xf32>
    %34 = vector.broadcast %33 : vector<1x32xf32> to vector<16x32xf32>
    %35 = arith.mulf %32, %34 : vector<16x32xf32>
    %36 = vector.extract_strided_slice %12 {offsets = [2, 0], sizes = [1, 32], strides = [1, 1]} : vector<3x32xf32> to vector<1x32xf32>
    %37 = vector.broadcast %36 : vector<1x32xf32> to vector<16x32xf32>
    %38 = arith.addf %35, %37 : vector<16x32xf32>
    %c0_16 = arith.constant 0 : index
    %c0_17 = arith.constant 0 : index
    %39 = vector.load %arg6[%c0_16, %c0_17] : memref<16x32xf32, #tpu.memory_space<vmem>>, vector<16x32xf32>
    tpu.vector_store %arg6[%c0_16, %c0_17], %38 {strides = array<i32>} : memref<16x32xf32, #tpu.memory_space<vmem>>, vector<16x32xf32>,
    return
  }
  func.func @transform_0(%arg0: i32) -> (i32, i32) {
    %c0_i32 = arith.constant 0 : i32
    %c0_i32_0 = arith.constant 0 : i32
    return %arg0, %c0_i32 : i32, i32
  }
  func.func @transform_1(%arg0: i32) -> (i32, i32) {
    %c0_i32 = arith.constant 0 : i32
    %c0_i32_0 = arith.constant 0 : i32
    %c0_i32_1 = arith.constant 0 : i32
    return %c0_i32, %c0_i32_0 : i32, i32
  }
  func.func @transform_2(%arg0: i32) -> (i32, i32) {
    %c0_i32 = arith.constant 0 : i32
    %c0_i32_0 = arith.constant 0 : i32
    %c0_i32_1 = arith.constant 0 : i32
    return %c0_i32, %c0_i32_0 : i32, i32
  }
  func.func @transform_3(%arg0: i32) -> (i32, i32) {
    %c0_i32 = arith.constant 0 : i32
    %c0_i32_0 = arith.constant 0 : i32
    %c0_i32_1 = arith.constant 0 : i32
    return %c0_i32, %c0_i32_0 : i32, i32
  }
  func.func @transform_4(%arg0: i32) -> (i32, i32) {
    %c0_i32 = arith.constant 0 : i32
    %c0_i32_0 = arith.constant 0 : i32
    %c0_i32_1 = arith.constant 0 : i32
    return %c0_i32, %c0_i32_0 : i32, i32
  }
  func.func @transform_5(%arg0: i32) -> (i32, i32) {
    %c0_i32 = arith.constant 0 : i32
    %c0_i32_0 = arith.constant 0 : i32
    return %arg0, %c0_i32 : i32, i32
  }
}

</mosaic_0001>

<bundles_post_ra>
// kernel: tpu_custom_call.1
= control target key start
LH: loop header
LB: loop body
LE: loop exit
PB: predicated region body
PF: predicated region fallthrough
CT: control target
= control target key end

     0   :  { %v362_v1 = vmov 0.0   ;;  %vm363_vm0 = vmmov 0   ;;  %vm48_vm1 = vcmask 261120   ;;  %s458_s0 = inlined_call_operand.vmem [shape: f32[16,32], index: 0, kind: input, shape index: {}]   ;;  %s459_s1 = inlined_call_operand.vmem [shape: bf16[32,128], index: 1, kind: input, shape index: {}]   ;;  %s460_s2 = inlined_call_operand.vmem [shape: f32[1,128], index: 2, kind: input, shape index: {}]   ;;  %s461_s3 = inlined_call_operand.vmem [shape: bf16[128,32], index: 3, kind: input, shape index: {}]   ;;  %s462_s4 = inlined_call_operand.vmem [shape: f32[3,32], index: 4, kind: input, shape index: {}]   ;;  %s463_s5 = inlined_call_operand.hbm [shape: f32[16,32], index: 5, kind: output, shape index: {}]  }
   0x1   :  { %v324_v0 = vld [vmem:[%s459_s1] sm:$0xff]   ;;  %291 = vmatprep.subr.bf16.mxu0 %v362_v1  ;;  %v325_v2 = vld [vmem:[%s459_s1 + $0x8] sm:$0xff]   ;;  %299 = vmatprep.subr.bf16.mxu1 %v362_v1  ;;  %v328_v8 = vld [vmem:[%s461_s3 + $0x10] sm:$0xff]  }
   0x2   :  { %292 = vmatpush3.bf16.msra.mxu0 %v324_v0  ;;  %295 = vmatprep.mubr.msk.bf16.mxu0 %vm363_vm0, %v362_v1  ;;  %v22_v3 = vld [vmem:[%s458_s0] sm:$0xff]  ;;  %v23_v4 = vld [vmem:[%s458_s0 + $0x8] sm:$0xff] }
   0x3   :  { %293 = vmatprep.subr.bf16.mxu0 %v362_v1  ;;  %v326_v5 = vld [vmem:[%s461_s3] sm:$0xff]   ;;  %315 = vmatprep.mubr.msk.bf16.mxu1 %vm363_vm0, %v362_v1  ;;  %v24_v6 = vpack.c.bf16 %v23_v4, %v22_v3  ;;  %v327_v7 = vld [vmem:[%s461_s3 + $0x8] sm:$0xff]  }
   0x4   :  { %300 = vmatpush3.bf16.msra.mxu1 %v326_v5 }
   0x5   :  { %301 = vmatprep.subr.bf16.mxu1 %v362_v1 }
   0x6   :  { %294 = vmatpush3.bf16.msra.mxu0 %v325_v2 }
   0x8   :  { %302 = vmatpush3.bf16.msra.mxu1 %v327_v7 }
   0x9   :  { %296 = vmatmul.mubr.msk.bf16.vlgmr.msra.gmra.mrb[0].mxu0 %vm48_vm1, %v24_v6  ;;  %303 = vmatprep.subr.bf16.mxu1 %v362_v1 }
   0xa   :  { %10 = vsyncpa [#allocation3], 0  ;;  %v329_v9 = vld [vmem:[%s461_s3 + $0x18] sm:$0xff]   ;;  %v330_v10 = vld [vmem:[%s461_s3 + $0x20] sm:$0xff]   ;;  %v204_v24 = vlaneseq }
   0xb   :  { %v331_v11 = vld [vmem:[%s461_s3 + $0x28] sm:$0xff]   ;;  %v332_v12 = vld [vmem:[%s461_s3 + $0x30] sm:$0xff]   ;;  %v333_v13 = vld [vmem:[%s461_s3 + $0x38] sm:$0xff]  }
   0xc   :  { %304 = vmatpush3.bf16.msra.mxu1 %v328_v8  ;;  %v267_v14 = vld [vmem:[%s460_s2] ss:$0 sm:$0xff]  ;;  %v205_v25 = vshrl.u32 %v204_v24, 7  ;;  %s364_s2 = smov [#allocation2]  }
   0xd   :  { %305 = vmatprep.subr.bf16.mxu1 %v362_v1  ;;  %v201_v28 = vld [vmem:[%s462_s4] sm:$0x7]  ;;  %s256_s4 = sshll.u32 %s364_s2, 4  ;;  %s257_s4 = int_to_ptr.vmem [resolvable:$true] %s256_s4 }
   0xe   :  { %v239_v26 = vsub.s32 1, %v205_v25  ;;  %v245_v27 = vsub.s32 2, %v205_v25  ;;  %v206_v31 = vsub.s32 0, %v205_v25  ;;  %s338_s18 = scalar_lea.vmem %s257_s4, 256  ;;  %p343_p1 = scmp.lt.s32.totalorder %s257_s4, %s257_s4 }
   0xf   :  { %p339_p0 = scmp.ne.s32.totalorder %s257_s4, %s338_s18  ;;  %p344_p2 = scmp.lt.s32.totalorder %s338_s18, %s338_s18 }
  0x10   :  { %306 = vmatpush3.bf16.msra.mxu1 %v329_v9  ;;  %v240_v29 = vrot.slane %v201_v28, %v239_v26  ;;  %v246_v30 = vrot.slane %v201_v28, %v245_v27  ;;  %v207_v32 = vrot.slane %v201_v28, %v206_v31 }
  0x11   :  { %307 = vmatprep.subr.bf16.mxu1 %v362_v1  ;;  %p345_p3 = por %p344_p2, %p343_p1 }
  0x13   :  { %p346_p4 = pnand %p345_p3, %p339_p0 }
  0x14   :  { %308 = vmatpush3.bf16.msra.mxu1 %v330_v10 }
  0x15   :  { %309 = vmatprep.subr.bf16.mxu1 %v362_v1 }
  0x18   :  { %310 = vmatpush3.bf16.msra.mxu1 %v331_v11 }
  0x19   :  { %311 = vmatprep.subr.bf16.mxu1 %v362_v1 }
  0x1c   :  { %312 = vmatpush3.bf16.msra.mxu1 %v332_v12 }
  0x1d   :  { %313 = vmatprep.subr.bf16.mxu1 %v362_v1 }
  0x20   :  { %314 = vmatpush3.bf16.msra.mxu1 %v333_v13 }
  0xdc   :  { %v86_v15 = vpop.f32.mrb[0].mxu0 }
  0xdd   :  { %v87_v16 = vadd.f32 %v267_v14, %v86_v15  ;;  %v297_v17 = vpop.f32.mrb[1].mxu0 }
  0xde   :  { %v89_v18 = vpop.f32.mrb[2].mxu0 }
  0xdf   :  { %v90_v19 = vadd.f32 %v267_v14, %v89_v18  ;;  %v298_v20 = vpop.f32.mrb[3].mxu0  ;;  %v93_v21 = vmax.f32 %v87_v16, 0.0 }
  0xe1   :  { %v94_v22 = vmax.f32 %v90_v19, 0.0 }
  0xe3   :  { %v95_v23 = vpack.c.bf16 %v94_v22, %v93_v21 }
  0xe5   :  { %316 = vmatmul.mubr.bf16.vlgmr.msra.gmra.mrb[0].mxu1 %v95_v23 }
 0x1b8   :  { %v194_v33 = vpop.f32.mrb[0].mxu1 }
 0x1b9   :  { %v202_v34 = vadd.f32 %v194_v33, %v22_v3  ;;  %v317_v35 = vpop.f32.mrb[1].mxu1 }
 0x1ba   :  { %v197_v36 = vpop.f32.mrb[2].mxu1 }
 0x1bb   :  { %v203_v37 = vadd.f32 %v197_v36, %v23_v4  ;;  %v318_v38 = vpop.f32.mrb[3].mxu1  ;;  %v208_v39 = vadd.f32 %v207_v32, %v202_v34 }
 0x1bd   :  { %v210_v40 = vsel %vm48_vm1, %v208_v39, 0.0  ;;  %v209_v41 = vadd.f32 %v207_v32, %v203_v37 }
 0x1be   :  { %211 = vadd.xlane.f32.xlu0 %v210_v40 }
 0x1bf   :  { %v213_v42 = vsel %vm48_vm1, %v209_v41, 0.0 }
 0x1c2   :  { %214 = vadd.xlane.f32.xlu0 %v213_v42 }
 0x24b   :  { %v212_v43 = vpop.xlane.xlu0 %211 }
 0x24c   :  { %v217_v44 = vmul.f32 0.03125, %v212_v43 }
 0x24e   :  { %v219_v45 = vsub.f32 %v208_v39, %v217_v44 }
 0x24f   :  { %v215_v46 = vpop.xlane.xlu0 %214 }
 0x250   :  { %v218_v47 = vmul.f32 0.03125, %v215_v46  ;;  %v221_v48 = vmul.f32 %v219_v45, %v219_v45 }
 0x252   :  { %v220_v49 = vsub.f32 %v209_v41, %v218_v47  ;;  %v223_v50 = vsel %vm48_vm1, %v221_v48, 0.0 }
 0x253   :  { %224 = vadd.xlane.f32.xlu1 %v223_v50 }
 0x254   :  { %v222_v51 = vmul.f32 %v220_v49, %v220_v49 }
 0x256   :  { %v226_v52 = vsel %vm48_vm1, %v222_v51, 0.0 }
 0x257   :  { %227 = vadd.xlane.f32.xlu1 %v226_v52 }
 0x2e0   :  { %v225_v53 = vpop.xlane.xlu1 %224 }
 0x2e1   :  { %v229_v54 = vmul.f32 0.03125, %v225_v53 }
 0x2e3   :  { %v231_v55 = vadd.f32 1e-05, %v229_v54 }
 0x2e4   :  { %v228_v56 = vpop.xlane.xlu1 %227 }
 0x2e5   :  { %334 = vrsqrt.f32 %v231_v55  ;;  %v230_v57 = vmul.f32 0.03125, %v228_v56 }
 0x2e7   :  { %v232_v58 = vadd.f32 1e-05, %v230_v57 }
 0x2e9   :  { %336 = vrsqrt.f32 %v232_v58 }
 0x2ef   :  { %v335_v59 = vpop.eup %334 }
 0x2f0   :  { %v235_v60 = vmul.f32 %v335_v59, %v219_v45 }
 0x2f2   :  { %v241_v61 = vmul.f32 %v240_v29, %v235_v60 }
 0x2f3   :  { %v337_v62 = vpop.eup %336 }
 0x2f4   :  { %v236_v63 = vmul.f32 %v337_v62, %v220_v49  ;;  %v247_v0 = vadd.f32 %v246_v30, %v241_v61 }
 0x2f6   :  { %v242_v1 = vmul.f32 %v240_v29, %v236_v63  ;;  %249 = vst.msk [vmem:[#allocation2] sm:$0xff] %vm48_vm1, %v247_v0 }
 0x2f8   :  { %v248_v2 = vadd.f32 %v246_v30, %v242_v1 }
 0x2fa   :  { %250 = vst.msk [vmem:[#allocation2 + $0x8] sm:$0xff] %vm48_vm1, %v248_v2 }
 0x2fb   :  { %349 = shalt.err (!%p346_p4)
}
 0x2fc   :  { %s350_s21 = scalar_lea.hbm %s463_s5, 256 }
 0x2fd   :  { %p351_p5 = scmp.ne.s32.totalorder %s463_s5, %s350_s21  ;;  %p354_p6 = scmp.lt.u32.totalorder %s350_s21, %s463_s5 }
 0x2ff   :  { %p356_p7 = pnand %p354_p6, %p351_p5 }
 0x301   :  { %359 = shalt.err (!%p356_p7)
}
 0x302   :  { %s365_s26 = smov 128   ;;  %s366_s27 = smov 8  }
 0x303   :  { %262 = dma.vmem_to_hbm [thread:$0]  %s257_s4, 256, %s463_s5, [#allocation3], %s365_s26, %s365_s26, %s366_s27  }
 0x304   :  { %360 = dma.done.wait [#allocation3], 256  }
 0x305   :  { %361 = vsyncadd [#allocation3], 4294967040 }
 0x306   :  { %266 = vsyncpa [#allocation3], 1 }

</bundles_post_ra>
